<compile_context>
chip_gen: v6e
topology: v6e:2x2x1
jax: 0.10.0
libtpu: 0.0.40
codegen_flags: <defaults>
</compile_context>

<pallas_src>
import jax
import jax.numpy as jnp
from jax.experimental import pallas as pl
from jax.experimental.pallas import tpu as pltpu


def diffusion_loss(x, z, noise, timestep, weights, biases, *, tn=512, tk=512):
    """DiffusionLoss forward.

    x        : (B, C, H, W) image
    z        : (B, D) conditioning, D = C*H*W
    noise    : (B, C, H, W) the randn_like(x) sample (MSE target)
    timestep : (B,) float timesteps
    weights  : (depth, D, D) in PyTorch nn.Linear layout (out_features, in_features)
    biases   : (depth, D)
    """
    B = x.shape[0]
    depth, D, D2 = weights.shape
    assert D == D2, "SimpleMLP uses square Linear(width, width) layers"

    x_flat = x.reshape(B, -1).astype(jnp.float32)
    noise_flat = noise.reshape(B, -1).astype(jnp.float32)
    assert x_flat.shape[1] == D and z.shape == (B, D)

    tn = min(tn, D)
    tk = min(tk, D)
    assert D % tn == 0 and D % tk == 0

    t_col = timestep.reshape(B, 1).astype(jnp.float32)
    z_flat = z.astype(jnp.float32)

    # PyTorch nn.Linear.weight is (out, in); transpose to (in, out) so the
    # kernel computes h @ W.  Stream the weights in bf16 (dominant HBM traffic).
    w_io = jnp.transpose(weights, (0, 2, 1)).astype(jnp.bfloat16)
    b3 = biases.reshape(depth, 1, D).astype(jnp.float32)

    n_ntiles = D // tn
    n_ktiles = D // tk
    inv_n_elems = 1.0 / float(B * D)

    def kernel(x_ref, noise_k_ref, z_ref, t_ref, noise_n_ref, w_ref, b_ref,
               loss_ref, h_in_ref, h_out_ref, acc_ref):
        l = pl.program_id(0)          # layer
        n = pl.program_id(1)          # output-feature tile
        k = pl.program_id(2)          # reduction (input-feature) tile
        n_layers = pl.num_programs(0)
        last_k = pl.num_programs(2) - 1

        # Very first grid step: zero the resident loss accumulator (and h_in,
        # purely so no uninitialized VMEM is ever read).
        @pl.when((l == 0) & (n == 0) & (k == 0))
        def _():
            loss_ref[...] = jnp.zeros_like(loss_ref)
            h_in_ref[...] = jnp.zeros_like(h_in_ref)

        # Start of every layer after the first: promote last layer's output.
        @pl.when((l > 0) & (n == 0) & (k == 0))
        def _():
            h_in_ref[...] = h_out_ref[...]

        # Start of every K reduction: zero the (B, tn) accumulator.
        @pl.when(k == 0)
        def _():
            acc_ref[...] = jnp.zeros_like(acc_ref)

        # Current K-slice of this layer's input activations.
        t = t_ref[...]                                            # (B, 1)
        # Layer-0 input: q_sample then combine  (x_t = x + noise*0.1*t; h0 = x_t + t + z)
        h0_k = x_ref[...] + noise_k_ref[...] * (0.1 * t) + t + z_ref[...]
        kcol = pl.multiple_of(k * tk, tk)
        hprev_k = h_in_ref[:, pl.ds(kcol, tk)]
        h_k = jnp.where(l == 0, h0_k, hprev_k)                    # (B, tk) f32

        # bf16 x bf16 -> f32 MXU matmul, accumulated over K tiles.
        acc_ref[...] += jnp.dot(h_k.astype(jnp.bfloat16), w_ref[0],
                                preferred_element_type=jnp.float32)

        # End of the K reduction: bias + ReLU, store the output tile.
        @pl.when(k == last_k)
        def _():
            h_out = jnp.maximum(acc_ref[...] + b_ref[0], 0.0)     # (B, tn) f32
            ncol = pl.multiple_of(n * tn, tn)
            h_out_ref[:, pl.ds(ncol, tn)] = h_out

        # Last layer: accumulate this tile's MSE partial sum into the resident
        # (1, 1) output block (written back to HBM exactly once, at the end).
        @pl.when((k == last_k) & (l == n_layers - 1))
        def _():
            ncol = pl.multiple_of(n * tn, tn)
            d = h_out_ref[:, pl.ds(ncol, tn)] - noise_n_ref[...]
            loss_ref[...] += jnp.sum(d * d) * inv_n_elems

    # Inputs only used on layer 0 (x, noise, z) or the last layer (MSE target)
    # keep a constant block index on the other layers, so they are not
    # re-DMA'd from HBM while the kernel is streaming weights.
    first_layer_col = lambda l, n, k: (0, jnp.where(l == 0, k, 0))
    last_layer_col = lambda l, n, k: (0, jnp.where(l == depth - 1, n, 0))

    loss = pl.pallas_call(
        kernel,
        out_shape=jax.ShapeDtypeStruct((1, 1), jnp.float32),
        grid=(depth, n_ntiles, n_ktiles),
        in_specs=[
            pl.BlockSpec((B, tk), first_layer_col),                 # x_flat
            pl.BlockSpec((B, tk), first_layer_col),                 # noise (K cols)
            pl.BlockSpec((B, tk), first_layer_col),                 # z
            pl.BlockSpec((B, 1), lambda l, n, k: (0, 0)),           # timestep column
            pl.BlockSpec((B, tn), last_layer_col),                  # noise (N cols, MSE)
            pl.BlockSpec((1, tk, tn), lambda l, n, k: (l, k, n)),   # W tile (bf16, in x out)
            pl.BlockSpec((1, 1, tn), lambda l, n, k: (l, 0, n)),    # bias tile
        ],
        out_specs=pl.BlockSpec((1, 1), lambda l, n, k: (0, 0)),
        scratch_shapes=[
            pltpu.VMEM((B, D), jnp.float32),    # h_in  (previous layer output)
            pltpu.VMEM((B, D), jnp.float32),    # h_out (current layer output)
            pltpu.VMEM((B, tn), jnp.float32),   # K-reduction accumulator
        ],
        compiler_params=pltpu.CompilerParams(
            dimension_semantics=("arbitrary", "arbitrary", "arbitrary"),
            vmem_limit_bytes=32 * 1024 * 1024,
        ),
    )(x_flat, noise_flat, z_flat, t_col, noise_flat, w_io, b3)
    return loss[0, 0]


def reference_loss(x, z, noise, timestep, weights, biases):
    """Pure-JAX reference mirroring the PyTorch module (weights quantized to
    bf16 exactly like the kernel's streaming path, accumulation in f32)."""
    B = x.shape[0]
    x_flat = x.reshape(B, -1)
    noise_flat = noise.reshape(B, -1)
    t = timestep.reshape(B, 1)
    x_t = x_flat + noise_flat * (0.1 * t)
    h = x_t + t + z
    w_bf16 = weights.astype(jnp.bfloat16)   # PyTorch layout: (out, in)
    for l in range(weights.shape[0]):
        h = jnp.dot(h.astype(jnp.bfloat16), w_bf16[l].T,
                    preferred_element_type=jnp.float32) + biases[l]
        h = jnp.maximum(h, 0.0)
    return jnp.mean((h - noise_flat) ** 2)


if __name__ == "__main__":
    # Small shapes: B=8, C=8, H=8, W=8  ->  D = width = 512, depth = 2.
    # Tile sizes of 256 exercise the tiled paths (2 N-tiles x 2 K-tiles).
    B, C, H, Wd = 8, 8, 8, 8
    D = C * H * Wd
    DEPTH = 2

    key = jax.random.PRNGKey(0)
    kx, kz, kn, kt, kw, kb = jax.random.split(key, 6)

    x = jax.random.normal(kx, (B, C, H, Wd), dtype=jnp.float32)      # image (NCHW)
    z = jax.random.normal(kz, (B, D), dtype=jnp.float32)             # conditioning
    noise = jax.random.normal(kn, (B, C, H, Wd), dtype=jnp.float32)  # randn_like(x)
    timestep = jax.random.randint(kt, (B,), 0, 1000).astype(jnp.float32)

    # PyTorch nn.Linear parameters: weight (out, in), bias (out,), init U(-1/sqrt(D), 1/sqrt(D)).
    bound = 1.0 / jnp.sqrt(jnp.float32(D))
    weights = jax.random.uniform(kw, (DEPTH, D, D), jnp.float32, -bound, bound)
    biases = jax.random.uniform(kb, (DEPTH, D), jnp.float32, -bound, bound)

    loss = diffusion_loss(x, z, noise, timestep, weights, biases, tn=256, tk=256)
    loss = jax.block_until_ready(loss)

    ref = reference_loss(x, z, noise, timestep, weights, biases)
    assert jnp.allclose(loss, ref, rtol=5e-3, atol=1e-4), (loss, ref)

    print("KERNEL_OK")
</pallas_src>

<mosaic_0001>
module attributes {stable_mosaic.version = 11 : i64} {
  func.func @kernel(%arg0: i32, %arg1: i32, %arg2: i32, %arg3: memref<8x256xf32, #tpu.memory_space<vmem>>, %arg4: memref<8x256xf32, #tpu.memory_space<vmem>>, %arg5: memref<8x256xf32, #tpu.memory_space<vmem>>, %arg6: memref<8x1xf32, #tpu.memory_space<vmem>>, %arg7: memref<8x256xf32, #tpu.memory_space<vmem>>, %arg8: memref<1x256x256xbf16, #tpu.memory_space<vmem>>, %arg9: memref<1x1x256xf32, #tpu.memory_space<vmem>>, %arg10: memref<1x1xf32, #tpu.memory_space<vmem>>, %arg11: memref<8x512xf32, #tpu.memory_space<vmem>>, %arg12: memref<8x512xf32, #tpu.memory_space<vmem>>, %arg13: memref<8x256xf32, #tpu.memory_space<vmem>>) attributes {dimension_semantics = [#tpu.dimension_semantics<arbitrary>, #tpu.dimension_semantics<arbitrary>, #tpu.dimension_semantics<arbitrary>], iteration_bounds = array<i64: 2, 2, 2>, scalar_prefetch = 0 : i64, scratch_operands = 3 : i64, tpu.core_type = #tpu.core_type<tc>, window_params = [{transform_indices = @transform_0, window_bounds = array<i64: 8, 256>}, {transform_indices = @transform_1, window_bounds = array<i64: 8, 256>}, {transform_indices = @transform_2, window_bounds = array<i64: 8, 256>}, {pipeline_mode = #tpu.pipeline_mode<synchronous>, transform_indices = @transform_3, window_bounds = array<i64: 8, 1>}, {transform_indices = @transform_4, window_bounds = array<i64: 8, 256>}, {transform_indices = @transform_5, window_bounds = array<i64: 1, 256, 256>}, {transform_indices = @transform_6, window_bounds = array<i64: 1, 1, 256>}, {pipeline_mode = #tpu.pipeline_mode<synchronous>, transform_indices = @transform_7, window_bounds = array<i64: 1, 1>}]} {
    %c0_i32 = arith.constant 0 : i32
    %0 = arith.cmpi eq, %arg0, %c0_i32 : i32
    %c0_i32_0 = arith.constant 0 : i32
    %1 = arith.cmpi eq, %arg1, %c0_i32_0 : i32
    %2 = arith.andi %0, %1 : i1
    %c0_i32_1 = arith.constant 0 : i32
    %3 = arith.cmpi eq, %arg2, %c0_i32_1 : i32
    %4 = arith.andi %2, %3 : i1
    %5 = arith.extui %4 : i1 to i32
    %c0_i32_2 = arith.constant 0 : i32
    %6 = arith.cmpi ne, %5, %c0_i32_2 : i32
    scf.if %6 {
      %cst_30 = arith.constant 0.000000e+00 : f32
      %50 = vector.broadcast %cst_30 : f32 to vector<1x1xf32>
      %c0_31 = arith.constant 0 : index
      %c0_32 = arith.constant 0 : index
      %51 = vector.load %arg10[%c0_31, %c0_32] : memref<1x1xf32, #tpu.memory_space<vmem>>, vector<1x1xf32>
      tpu.vector_store %arg10[%c0_31, %c0_32], %50 {strides = array<i32>} : memref<1x1xf32, #tpu.memory_space<vmem>>, vector<1x1xf32>,
      %cst_33 = arith.constant 0.000000e+00 : f32
      %52 = vector.broadcast %cst_33 : f32 to vector<8x512xf32>
      %c0_34 = arith.constant 0 : index
      %c0_35 = arith.constant 0 : index
      %53 = vector.load %arg11[%c0_34, %c0_35] : memref<8x512xf32, #tpu.memory_space<vmem>>, vector<8x512xf32>
      tpu.vector_store %arg11[%c0_34, %c0_35], %52 {strides = array<i32>} : memref<8x512xf32, #tpu.memory_space<vmem>>, vector<8x512xf32>,
    } else {
    }
    %c0_i32_3 = arith.constant 0 : i32
    %7 = arith.cmpi sgt, %arg0, %c0_i32_3 : i32
    %c0_i32_4 = arith.constant 0 : i32
    %8 = arith.cmpi eq, %arg1, %c0_i32_4 : i32
    %9 = arith.andi %7, %8 : i1
    %c0_i32_5 = arith.constant 0 : i32
    %10 = arith.cmpi eq, %arg2, %c0_i32_5 : i32
    %11 = arith.andi %9, %10 : i1
    %12 = arith.extui %11 : i1 to i32
    %c0_i32_6 = arith.constant 0 : i32
    %13 = arith.cmpi ne, %12, %c0_i32_6 : i32
    scf.if %13 {
      %c0_30 = arith.constant 0 : index
      %c0_31 = arith.constant 0 : index
      %50 = vector.load %arg12[%c0_30, %c0_31] : memref<8x512xf32, #tpu.memory_space<vmem>>, vector<8x512xf32>
      %c0_32 = arith.constant 0 : index
      %c0_33 = arith.constant 0 : index
      %51 = vector.load %arg11[%c0_32, %c0_33] : memref<8x512xf32, #tpu.memory_space<vmem>>, vector<8x512xf32>
      tpu.vector_store %arg11[%c0_32, %c0_33], %50 {strides = array<i32>} : memref<8x512xf32, #tpu.memory_space<vmem>>, vector<8x512xf32>,
    } else {
    }
    %c0_i32_7 = arith.constant 0 : i32
    %14 = arith.cmpi eq, %arg2, %c0_i32_7 : i32
    %15 = arith.extui %14 : i1 to i32
    %c0_i32_8 = arith.constant 0 : i32
    %16 = arith.cmpi ne, %15, %c0_i32_8 : i32
    scf.if %16 {
      %cst_30 = arith.constant 0.000000e+00 : f32
      %50 = vector.broadcast %cst_30 : f32 to vector<8x256xf32>
      %c0_31 = arith.constant 0 : index
      %c0_32 = arith.constant 0 : index
      %51 = vector.load %arg13[%c0_31, %c0_32] : memref<8x256xf32, #tpu.memory_space<vmem>>, vector<8x256xf32>
      tpu.vector_store %arg13[%c0_31, %c0_32], %50 {strides = array<i32>} : memref<8x256xf32, #tpu.memory_space<vmem>>, vector<8x256xf32>,
    } else {
    }
    %c0 = arith.constant 0 : index
    %c0_9 = arith.constant 0 : index
    %17 = vector.load %arg6[%c0, %c0_9] : memref<8x1xf32, #tpu.memory_space<vmem>>, vector<8x1xf32>
    %c0_10 = arith.constant 0 : index
    %c0_11 = arith.constant 0 : index
    %18 = vector.load %arg3[%c0_10, %c0_11] : memref<8x256xf32, #tpu.memory_space<vmem>>, vector<8x256xf32>
    %c0_12 = arith.constant 0 : index
    %c0_13 = arith.constant 0 : index
    %19 = vector.load %arg4[%c0_12, %c0_13] : memref<8x256xf32, #tpu.memory_space<vmem>>, vector<8x256xf32>
    %cst = arith.constant 1.000000e-01 : f32
    %20 = vector.broadcast %cst : f32 to vector<8x1xf32>
    %21 = arith.mulf %20, %17 : vector<8x1xf32>
    %22 = vector.broadcast %21 : vector<8x1xf32> to vector<8x256xf32>
    %23 = arith.mulf %19, %22 : vector<8x256xf32>
    %24 = arith.addf %18, %23 : vector<8x256xf32>
    %25 = vector.broadcast %17 : vector<8x1xf32> to vector<8x256xf32>
    %26 = arith.addf %24, %25 : vector<8x256xf32>
    %c0_14 = arith.constant 0 : index
    %c0_15 = arith.constant 0 : index
    %27 = vector.load %arg5[%c0_14, %c0_15] : memref<8x256xf32, #tpu.memory_space<vmem>>, vector<8x256xf32>
    %28 = arith.addf %26, %27 : vector<8x256xf32>
    %c256_i32 = arith.constant 256 : i32
    %29 = arith.muli %arg2, %c256_i32 : i32
    %30 = tpu.assume_multiple %29, 256 : i32
    %c0_16 = arith.constant 0 : index
    %31 = arith.index_cast %30 : i32 to index
    %32 = vector.load %arg11[%c0_16, %31] : memref<8x512xf32, #tpu.memory_space<vmem>>, vector<8x256xf32>
    %c0_i32_17 = arith.constant 0 : i32
    %33 = arith.cmpi eq, %arg0, %c0_i32_17 : i32
    %34 = arith.select %33, %28, %32 : vector<8x256xf32>
    %c0_18 = arith.constant 0 : index
    %c0_19 = arith.constant 0 : index
    %35 = vector.load %arg13[%c0_18, %c0_19] : memref<8x256xf32, #tpu.memory_space<vmem>>, vector<8x256xf32>
    %36 = arith.truncf %34 : vector<8x256xf32> to vector<8x256xbf16>
    %c0_20 = arith.constant 0 : index
    %c0_21 = arith.constant 0 : index
    %c0_22 = arith.constant 0 : index
    %37 = vector.load %arg8[%c0_20, %c0_21, %c0_22] : memref<1x256x256xbf16, #tpu.memory_space<vmem>>, vector<1x256x256xbf16>
    %38 = vector.shape_cast %37 : vector<1x256x256xbf16> to vector<256x256xbf16>
    %cst_23 = arith.constant dense<0.000000e+00> : vector<8x256xf32>
    %39 = tpu.matmul %36, %38, %cst_23 {dimension_numbers = #tpu.dot_dimension_numbers<[1], [0], [0], [1], [0, 0, 1, 1], [], []>} : vector<8x256xbf16>, vector<256x256xbf16>, vector<8x256xf32> -> vector<8x256xf32>
    %40 = arith.addf %35, %39 : vector<8x256xf32>
    %c0_24 = arith.constant 0 : index
    %c0_25 = arith.constant 0 : index
    %41 = vector.load %arg13[%c0_24, %c0_25] : memref<8x256xf32, #tpu.memory_space<vmem>>, vector<8x256xf32>
    tpu.vector_store %arg13[%c0_24, %c0_25], %40 {strides = array<i32>} : memref<8x256xf32, #tpu.memory_space<vmem>>, vector<8x256xf32>,
    %c1_i32 = arith.constant 1 : i32
    %42 = arith.cmpi eq, %arg2, %c1_i32 : i32
    %43 = arith.extui %42 : i1 to i32
    %c0_i32_26 = arith.constant 0 : i32
    %44 = arith.cmpi ne, %43, %c0_i32_26 : i32
    scf.if %44 {
      %c0_30 = arith.constant 0 : index
      %c0_31 = arith.constant 0 : index
      %50 = vector.load %arg13[%c0_30, %c0_31] : memref<8x256xf32, #tpu.memory_space<vmem>>, vector<8x256xf32>
      %c0_32 = arith.constant 0 : index
      %c0_33 = arith.constant 0 : index
      %c0_34 = arith.constant 0 : index
      %51 = vector.load %arg9[%c0_32, %c0_33, %c0_34] : memref<1x1x256xf32, #tpu.memory_space<vmem>>, vector<1x1x256xf32>
      %52 = vector.shape_cast %51 : vector<1x1x256xf32> to vector<1x256xf32>
      %53 = vector.broadcast %52 : vector<1x256xf32> to vector<8x256xf32>
      %54 = arith.addf %50, %53 : vector<8x256xf32>
      %cst_35 = arith.constant 0.000000e+00 : f32
      %55 = vector.broadcast %cst_35 : f32 to vector<8x256xf32>
      %56 = arith.maximumf %54, %55 : vector<8x256xf32>
      %c256_i32_36 = arith.constant 256 : i32
      %57 = arith.muli %arg1, %c256_i32_36 : i32
      %58 = tpu.assume_multiple %57, 256 : i32
      %c0_37 = arith.constant 0 : index
      %59 = arith.index_cast %58 : i32 to index
      %60 = vector.load %arg12[%c0_37, %59] : memref<8x512xf32, #tpu.memory_space<vmem>>, vector<8x256xf32>
      tpu.vector_store %arg12[%c0_37, %59], %56 {strides = array<i32>} : memref<8x512xf32, #tpu.memory_space<vmem>>, vector<8x256xf32>,
    } else {
    }
    %c1_i32_27 = arith.constant 1 : i32
    %45 = arith.cmpi eq, %arg2, %c1_i32_27 : i32
    %c1_i32_28 = arith.constant 1 : i32
    %46 = arith.cmpi eq, %arg0, %c1_i32_28 : i32
    %47 = arith.andi %45, %46 : i1
    %48 = arith.extui %47 : i1 to i32
    %c0_i32_29 = arith.constant 0 : i32
    %49 = arith.cmpi ne, %48, %c0_i32_29 : i32
    scf.if %49 {
      %c256_i32_30 = arith.constant 256 : i32
      %50 = arith.muli %arg1, %c256_i32_30 : i32
      %51 = tpu.assume_multiple %50, 256 : i32
      %c0_31 = arith.constant 0 : index
      %52 = arith.index_cast %51 : i32 to index
      %53 = vector.load %arg12[%c0_31, %52] : memref<8x512xf32, #tpu.memory_space<vmem>>, vector<8x256xf32>
      %c0_32 = arith.constant 0 : index
      %c0_33 = arith.constant 0 : index
      %54 = vector.load %arg7[%c0_32, %c0_33] : memref<8x256xf32, #tpu.memory_space<vmem>>, vector<8x256xf32>
      %55 = arith.subf %53, %54 : vector<8x256xf32>
      %c0_34 = arith.constant 0 : index
      %c0_35 = arith.constant 0 : index
      %56 = vector.load %arg10[%c0_34, %c0_35] : memref<1x1xf32, #tpu.memory_space<vmem>>, vector<1x1xf32>
      %57 = arith.mulf %55, %55 : vector<8x256xf32>
      %58 = vector.shape_cast %57 : vector<8x256xf32> to vector<1x8x256xf32>
      %cst_36 = arith.constant dense<0.000000e+00> : vector<1xf32>
      %59 = vector.multi_reduction <add>, %58, %cst_36 [1, 2] : vector<1x8x256xf32> to vector<1xf32>
      %60 = vector.shape_cast %59 : vector<1xf32> to vector<1x1x1xf32>
      %61 = vector.extract %60[0, 0, 0] : f32 from vector<1x1x1xf32>
      %cst_37 = arith.constant 2.44140625E-4 : f32
      %62 = arith.mulf %61, %cst_37 : f32
      %63 = vector.broadcast %62 : f32 to vector<1x1xf32>
      %64 = arith.addf %56, %63 : vector<1x1xf32>
      %c0_38 = arith.constant 0 : index
      %c0_39 = arith.constant 0 : index
      %65 = vector.load %arg10[%c0_38, %c0_39] : memref<1x1xf32, #tpu.memory_space<vmem>>, vector<1x1xf32>
      tpu.vector_store %arg10[%c0_38, %c0_39], %64 {strides = array<i32>} : memref<1x1xf32, #tpu.memory_space<vmem>>, vector<1x1xf32>,
    } else {
    }
    return
  }
  func.func @transform_0(%arg0: i32, %arg1: i32, %arg2: i32) -> (i32, i32) {
    %c0_i32 = arith.constant 0 : i32
    %0 = arith.cmpi eq, %arg0, %c0_i32 : i32
    %c0_i32_0 = arith.constant 0 : i32
    %1 = arith.select %0, %arg2, %c0_i32_0 : i32
    %c0_i32_1 = arith.constant 0 : i32
    %c0_i32_2 = arith.constant 0 : i32
    return %c0_i32_1, %1 : i32, i32
  }
  func.func @transform_1(%arg0: i32, %arg1: i32, %arg2: i32) -> (i32, i32) {
    %c0_i32 = arith.constant 0 : i32
    %0 = arith.cmpi eq, %arg0, %c0_i32 : i32
    %c0_i32_0 = arith.constant 0 : i32
    %1 = arith.select %0, %arg2, %c0_i32_0 : i32
    %c0_i32_1 = arith.constant 0 : i32
    %c0_i32_2 = arith.constant 0 : i32
    return %c0_i32_1, %1 : i32, i32
  }
  func.func @transform_2(%arg0: i32, %arg1: i32, %arg2: i32) -> (i32, i32) {
    %c0_i32 = arith.constant 0 : i32
    %0 = arith.cmpi eq, %arg0, %c0_i32 : i32
    %c0_i32_0 = arith.constant 0 : i32
    %1 = arith.select %0, %arg2, %c0_i32_0 : i32
    %c0_i32_1 = arith.constant 0 : i32
    %c0_i32_2 = arith.constant 0 : i32
    return %c0_i32_1, %1 : i32, i32
  }
  func.func @transform_3(%arg0: i32, %arg1: i32, %arg2: i32) -> (i32, i32) {
    %c0_i32 = arith.constant 0 : i32
    %c0_i32_0 = arith.constant 0 : i32
    %c0_i32_1 = arith.constant 0 : i32
    return %c0_i32, %c0_i32_0 : i32, i32
  }
  func.func @transform_4(%arg0: i32, %arg1: i32, %arg2: i32) -> (i32, i32) {
    %c1_i32 = arith.constant 1 : i32
    %0 = arith.cmpi eq, %arg0, %c1_i32 : i32
    %c0_i32 = arith.constant 0 : i32
    %1 = arith.select %0, %arg1, %c0_i32 : i32
    %c0_i32_0 = arith.constant 0 : i32
    %c0_i32_1 = arith.constant 0 : i32
    return %c0_i32_0, %1 : i32, i32
  }
  func.func @transform_5(%arg0: i32, %arg1: i32, %arg2: i32) -> (i32, i32, i32) {
    %c0_i32 = arith.constant 0 : i32
    return %arg0, %arg2, %arg1 : i32, i32, i32
  }
  func.func @transform_6(%arg0: i32, %arg1: i32, %arg2: i32) -> (i32, i32, i32) {
    %c0_i32 = arith.constant 0 : i32
    %c0_i32_0 = arith.constant 0 : i32
    return %arg0, %c0_i32, %arg1 : i32, i32, i32
  }
  func.func @transform_7(%arg0: i32, %arg1: i32, %arg2: i32) -> (i32, i32) {
    %c0_i32 = arith.constant 0 : i32
    %c0_i32_0 = arith.constant 0 : i32
    %c0_i32_1 = arith.constant 0 : i32
    return %c0_i32, %c0_i32_0 : i32, i32
  }
}

</mosaic_0001>

<bundles_post_ra>
// kernel: tpu_custom_call.1
= control target key start
LH: loop header
LB: loop body
LE: loop exit
PB: predicated region body
PF: predicated region fallthrough
CT: control target
= control target key end

     0   :  { %s2236_s0 = inlined_call_operand.hbm [shape: f32[8,512], index: 0, kind: input, shape index: {}]   ;;  %s2237_s1 = inlined_call_operand.hbm [shape: f32[8,512], index: 1, kind: input, shape index: {}]   ;;  %s2238_s2 = inlined_call_operand.hbm [shape: f32[8,512], index: 2, kind: input, shape index: {}]   ;;  %s2239_s3 = inlined_call_operand.vmem [shape: f32[8,1], index: 3, kind: input, shape index: {}]   ;;  %s2240_s4 = inlined_call_operand.hbm [shape: f32[8,512], index: 4, kind: input, shape index: {}]   ;;  %s2241_s5 = inlined_call_operand.hbm [shape: bf16[2,512,512], index: 5, kind: input, shape index: {}]   ;;  %s2242_s6 = inlined_call_operand.vmem [shape: f32[2,1,512], index: 6, kind: input, shape index: {}]   ;;  %s2243_s7 = inlined_call_operand.hbm [shape: f32[1,1], index: 7, kind: output, shape index: {}]  }
   0x1   :  { %2272 = sst [smem:[#allocation37_spill]] %s2236_s0 }
   0x2   :  { %2273 = sst [smem:[#allocation38_spill]] %s2237_s1 }
   0x3   :  { %2274 = sst [smem:[#allocation39_spill]] %s2238_s2 }
   0x4   :  { %2275 = sst [smem:[#allocation40_spill]] %s2239_s3 }
   0x5   :  { %2276 = sst [smem:[#allocation41_spill]] %s2240_s4 }
   0x6   :  { %2277 = sst [smem:[#allocation42_spill]] %s2241_s5 }
   0x7   :  { %2278 = sst [smem:[#allocation43_spill]] %s2242_s6 }
   0x8   :  { %2279 = sst [smem:[#allocation44_spill]] %s2243_s7 }
   0x9   :  { %12 = vsyncpa [#allocation6], 0 }
   0xa   :  { %14 = vsyncpa [#allocation6 + $0x1], 0 }
   0xb   :  { %15 = vsyncpa [#allocation9], 0 }
   0xc   :  { %17 = vsyncpa [#allocation9 + $0x1], 0 }
   0xd   :  { %18 = vsyncpa [#allocation12], 0 }
   0xe   :  { %20 = vsyncpa [#allocation12 + $0x1], 0 }
   0xf   :  { %21 = vsyncpa [#allocation7], 0  ;;  %s1755_s24 = smov 0   ;;  %s1757_s25 = smov 0  }
  0x10   :  { %s1759_s26 = smov 0   ;;  %s1761_s27 = smov 0  }
  0x11   :  { %s1763_s28 = smov 0   ;;  %s1765_s29 = smov 0  }
  0x12   :  { %s1767_s30 = smov 0   ;;  %s1769_s8 = smov 0  }
  0x13   :  { %s1771_s9 = smov 0   ;;  %s1773_s10 = smov 0  }
  0x14   :  { %s1775_s11 = smov 0   ;;  %s1777_s12 = smov 0  }
  0x15   :  { %s1779_s13 = smov 0   ;;  %s1781_s14 = smov 0  }
  0x16   :  { %s1783_s15 = smov 0   ;;  %s1785_s16 = smov 0  }
  0x17 LB: > { %2280 = sst [smem:[#allocation20_spill]] %s1645_s25  ;;  %s1836_s17 = sadd.s32 4294967295, %s1701_s16   ;;  %s1701_s16 = sphi %s1785_s16, %s27_s16   ;;  %s1697_s15 = sphi %s1783_s15, %s2368_s15   ;;  %s1693_s14 = sphi %s1781_s14, %s2367_s14   ;;  %s1689_s13 = sphi %s1779_s13, %s2366_s13   ;;  %s1685_s12 = sphi %s1777_s12, %s2365_s12   ;;  %s1681_s11 = sphi %s1775_s11, %s2364_s11   ;;  %s1677_s10 = sphi %s1773_s10, %s2363_s10   ;;  %s1673_s9 = sphi %s1771_s9, %s2362_s9   ;;  %s1669_s8 = sphi %s1769_s8, %s2361_s8   ;;  %s1665_s30 = sphi %s1767_s30, %s2352_s30   ;;  %s1661_s29 = sphi %s1765_s29, %s2360_s29   ;;  %s1657_s28 = sphi %s1763_s28, %s2359_s28   ;;  %s1653_s27 = sphi %s1761_s27, %s2351_s27   ;;  %s1649_s26 = sphi %s1759_s26, %s2358_s26   ;;  %s1645_s25 = sphi %s1757_s25, %s2357_s25   ;;  %s1641_s24 = sphi %s1755_s24, %s2350_s24  }
  0x18   : > { %2281 = sst [smem:[#allocation21_spill]] %s1657_s28  ;;  %s39_s18 = sadd.s32 1, %s1689_s13 }
  0x19   : > { %2282 = sst [smem:[#allocation22_spill]] %s1669_s8  ;;  %p40_p0 = scmp.ge.s32.totalorder %s39_s18, 2 }
  0x1a   : > { %2283 = sst [smem:[#allocation23_spill]] %s1677_s10  ;;  %s42_s19 = sadd.s32 1, %s1693_s14 }
  0x1b   : > { %2284 = sst [smem:[#allocation24_spill]] %s1681_s11  ;;  %s46_s20 = sadd.s32 1, %s1697_s15 }
  0x1c   : > { %2285 = sst [smem:[#allocation25_spill]] %s1685_s12  ;;  %p50_p1 = scmp.eq.s32.totalorder %s1697_s15, 0 }
  0x1d   : > { %2286 = sst [smem:[#allocation26_spill]] %s1836_s17  ;;  %s2370_s18 = smov (%p40_p0, %s39_s18), 0 }
  0x1e   : > { %2287 = sst [smem:[#allocation27_spill]] %s2370_s18  ;;  %s2372_s19 = smov (!%p40_p0, %s42_s19), %s1693_s14 }
  0x1f   : > { %s51_s21 = scalar_select %p50_p1, %s1689_s13, 0 }
  0x20   : > { %p44_p2 = scmp.ge.s32.totalorder %s2372_s19, 2  ;;  %s57_s22 = sadd.s32 1, %s1673_s9 }
  0x21   : > { %p64_p3 = scmp.ne.s32.totalorder %s1673_s9, %s1669_s8  ;;  %p2257_p4 = scmp.eq.s32.totalorder %s1701_s16, 0 }
  0x22   : > { %s2374_s20 = smov (!%p44_p2, %s46_s20), %s1697_s15  ;;  %p70_p6 = scmp.ne.s32.totalorder %s1669_s8, %s1665_s30 }
  0x23   : > { %p1858_p5 = por %p2257_p4, %p64_p3  ;;  %p48_p7 = scmp.ge.s32.totalorder %s2374_s20, 2 }
  0x24   : > { %p2256_p8 = scmp.eq.s32.totalorder %s1836_s17, 0  ;;  %p205_p9 = scmp.ne.s32.totalorder %s1649_s26, %s1645_s25 }
  0x25   : > { %s2376_s20 = smov (%p48_p7, %s2374_s20), 0  ;;  %p211_p13 = scmp.ne.s32.totalorder %s1645_s25, %s1641_s24 }
  0x26   : > { %2289 = sst [smem:[#allocation28_spill]] %s2376_s20  ;;  %p1873_p10 = por %p2256_p8, %p70_p6 }
  0x27   : > { %p1879_p11 = por %p205_p9, %p2257_p4  ;;  %p52_p12 = scmp.eq.s32.totalorder %s2376_s20, 0 }
  0x28   : > { %s2290_s3 = scalar_select %p1873_p10, 1, 0 }
  0x29   : > { %p2259_p0 = scmp.lt.s32.totalorder %s1701_s16, 8  ;;  %p1890_p1 = por %p211_p13, %p2256_p8 }
  0x2a   : > { %2291 = sst [smem:[#allocation29_spill]] %s2290_s3  ;;  %s2254_s10 = sand.u32 1, %s1673_s9  }
  0x2b   : > { %s53_s30 = scalar_select %p52_p12, %s2370_s18, 0 }
  0x2c   : > { %s2293_s7 = scalar_select %p1890_p1, 1, 0 }
  0x2d   : > { %s54_s12 = ssub.s32 %s51_s21, %s53_s30  ;;  %s1897_s11 = sshll.u32 %s2254_s10, 4 }
  0x2e   : > { %2294 = sst [smem:[#allocation30_spill]] %s2293_s7  ;;  %p55_p3 = scmp.eq.s32.totalorder %s54_s12, 0 }
  0x2f   : > { %s1899_s3 = sshll.u32 %s51_s21, 8  ;;  %p1905_p6 = pnand %p2259_p0, %p1858_p5 }
  0x30   : > { %s2260_s25 = sand.u32 1, %s1701_s16   ;;  %s2297_s1 = sld [smem:[#allocation38_spill]] }
  0x31   : > { %s1911_s7 = scalar_select %p55_p3, %s1673_s9, %s57_s22  }
  0x32   : > { %s312_s5 = scalar_lea.vmem [#allocation8], %s1897_s11  ;;  %s1111_s21 = sshll.u32 %s1693_s14, 1 }
  0x33   : > { %2296 = sst [smem:[#allocation31_spill]] %s1911_s7  ;;  %s322_s12 = sshll.u32 %s312_s5, 4  ;;  %s323_s12 = int_to_ptr.vmem [resolvable:$true] %s322_s12 }
  0x34   : > { %s1171_s23 = sshll.u32 %s1689_s13, 7  ;;  %s1922_s2 = scalar_lea.sflag [#allocation9], %s2260_s25 }
  0x35   : > { %2298 = sst [smem:[#allocation32_spill]] %s1922_s2  ;;  %p2258_p5 = pneg %p1905_p6 }
  0x36   : > { %s320_s10 = scalar_lea.hbm %s2297_s1, %s1899_s3  ;;  %s1404_s0 = scalar_lea.vmem %s323_s12, 256 }
  0x37   : > { %p1405_p7 = scmp.ne.s32.totalorder %s323_s12, %s1404_s0  ;;  %s1703_s22 = smov [#allocation8]  }
  0x38   : > { %s1409_s7 = sshll.u32 %s1703_s22, 4  ;;  %s1410_s7 = int_to_ptr.vmem [resolvable:$false] %s1409_s7 }
  0x39   : > { %p1407_p9 = pnand %p1405_p7, %p2258_p5  ;;  %s1411_s8 = scalar_lea.vmem %s1410_s7, 512 }
  0x3a   : > { %p1412_p13 = scmp.lt.s32.totalorder %s323_s12, %s1410_s7  ;;  %p1413_p3 = scmp.lt.s32.totalorder %s1411_s8, %s1404_s0 }
  0x3b   : > { %p1408_p12 = pneg %p1407_p9 }
  0x3c   : > { %p1414_p8 = por %p1413_p3, %p1412_p13 }
  0x3e   : > { %p1415_p4 = pnand %p1414_p8, %p1408_p12 }
  0x40   : > { %1418 = shalt.err (!%p1415_p4)
}
  0x41   : > { %1194 = dma.hbm_to_vmem [thread:$0]  (!%p1905_p6), %s320_s10, 256, %s323_s12, %s1922_s2  }
  0x42   : > { %s1932_s0 = sadd.s32 %s1171_s23, %s1111_s21  ;;  %p1938_p4 = pnand %p2259_p0, %p1879_p11 }
  0x43   : > { %2299 = sst [smem:[#allocation33_spill]] %s1932_s0  ;;  %p1115_p8 = scmp.ge.s32.totalorder %s1701_s16, 1 }
  0x44   : > { %s2300_s5 = scalar_select %p1938_p4, 1, 0 }
  0x45   : > { %p407_p7 = scmp.lt.s32.totalorder %s1701_s16, 9  ;;  %s2378_s19 = smov (%p44_p2, %s2372_s19), 0 }
  0x46   : > { %2301 = sst [smem:[#allocation34_spill]] %s2300_s5  ;;  %p161_p11 = scmp.eq.s32.totalorder %s1697_s15, 1 }
  0x47   : > { %p1944_p9 = pnand %p1115_p8, %p407_p7  ;;  %2304 = sst [smem:[#allocation36_spill]] %s2378_s19 }
  0x48   : > { %p163_p12 = scmp.eq.s32.totalorder %s2376_s20, 1  ;;  %s168_s6 = sadd.s32 1, %s1661_s29 }
  0x49   : > { %s2302_s7 = scalar_select %p1944_p9, 1, 0 }
  0x4a   : > { %p175_p13 = scmp.ne.s32.totalorder %s1661_s29, %s1657_s28  ;;  %p2305_p3 = scmp.eq.s32.totalorder %s1701_s16, 0 }
  0x4b   : > { %2303 = sst [smem:[#allocation35_spill]] %s2302_s7  ;;  %p181_p7 = scmp.ne.s32.totalorder %s1657_s28, %s1653_s27 }
  0x4c   : > { %s162_s10 = scalar_select %p161_p11, %s1693_s14, 0 }
  0x4d   : > { %s164_s30 = scalar_select %p163_p12, %s2378_s19, 0 }
  0x4e   : > { %p1962_p8 = por %p175_p13, %p2305_p3  ;;  %s191_s23 = ssub.s32 %s1697_s15, %s2376_s20 }
  0x4f   : > { %s165_s21 = ssub.s32 %s162_s10, %s164_s30  ;;  %p2307_p5 = scmp.eq.s32.totalorder %s1836_s17, 0 }
  0x50   : > { %p166_p2 = scmp.eq.s32.totalorder %s165_s21, 0  ;;  %s2309_s8 = ssub.s32 %s1689_s13, %s2370_s18 }
  0x51   : > { %p1972_p0 = por %p181_p7, %p2307_p5  ;;  %s193_s25 = sor.u32 %s2309_s8, %s191_s23 }
  0x52   : > { %s194_s1 = ssub.s32 %s1693_s14, %s2378_s19  ;;  %s198_s0 = sadd.s32 1, %s1649_s26 }
  0x53   : > { %s1982_s7 = scalar_select %p166_p2, %s1661_s29, %s168_s6  }
  0x54   : > { %s195_s5 = sor.u32 %s194_s1, %s193_s25  ;;  %s352_s27 = sand.u32 1, %s1661_s29  }
  0x55   : > { %p196_p11 = scmp.eq.s32.totalorder %s195_s5, 0  ;;  %s1170_s28 = sshll.u32 %s162_s10, 8 }
  0x56   : > { %s1106_s30 = sshll.u32 %s352_s27, 4  ;;  %s2310_s4 = sld [smem:[#allocation41_spill]] }
  0x57   : > { %s1987_s2 = scalar_select %p196_p11, %s1649_s26, %s198_s0  }
  0x58   : > { %p2311_p5 = scmp.lt.s32.totalorder %s1701_s16, 8  ;;  %s354_s6 = scalar_lea.vmem [#allocation11], %s1106_s30 }
  0x59   : > { %s364_s1 = sshll.u32 %s354_s6, 4  ;;  %s2313_s25 = sand.u32 1, %s1701_s16   ;;  %s365_s1 = int_to_ptr.vmem [resolvable:$true] %s364_s1 }
  0x5a   : > { %p1996_p12 = pnand %p2311_p5, %p1962_p8  ;;  %s2002_s5 = scalar_lea.sflag [#allocation12], %s2313_s25 }
  0x5b   : > { %s1432_s0 = scalar_lea.vmem %s365_s1, 256 }
  0x5c   : > { %s362_s17 = scalar_lea.hbm %s2310_s4, %s1170_s28  ;;  %p1421_p13 = pneg %p1996_p12 }
  0x5d   : > { %p1433_p3 = scmp.ne.s32.totalorder %s365_s1, %s1432_s0  ;;  %s1704_s28 = smov [#allocation11]  }
  0x5e   : > { %s1437_s20 = sshll.u32 %s1704_s28, 4  ;;  %s1438_s20 = int_to_ptr.vmem [resolvable:$false] %s1437_s20 }
  0x5f   : > { %p1435_p7 = pnand %p1433_p3, %p1421_p13  ;;  %s1439_s10 = scalar_lea.vmem %s1438_s20, 512 }
  0x60   : > { %p1440_p8 = scmp.lt.s32.totalorder %s365_s1, %s1438_s20  ;;  %p1441_p11 = scmp.lt.s32.totalorder %s1439_s10, %s1432_s0 }
  0x61   : > { %p1436_p2 = pneg %p1435_p7 }
  0x62   : > { %p1442_p5 = por %p1441_p11, %p1440_p8 }
  0x64   : > { %p1443_p1 = pnand %p1442_p5, %p1436_p2 }
  0x66   : > { %1446 = shalt.err (!%p1443_p1)
}
  0x67   : > { %1200 = dma.hbm_to_vmem [thread:$0]  (!%p1996_p12), %s362_s17, 256, %s365_s1, %s2002_s5  }
  0x68   : > { %s2314_s8 = sld [smem:[#allocation37_spill]]  ;;  %s291_s30 = scalar_lea.vmem [#allocation5], %s1897_s11 }
  0x69   : > { %s301_s21 = sshll.u32 %s291_s30, 4  ;;  %s2315_s0 = sld [smem:[#allocation39_spill]]  ;;  %s302_s21 = int_to_ptr.vmem [resolvable:$true] %s301_s21 }
  0x6a   : > { %s2316_s20 = sand.u32 1, %s1673_s9   ;;  %s1460_s10 = scalar_lea.vmem %s302_s21, 256 }
  0x6b   : > { %s288_s18 = scalar_lea.sflag [#allocation6], %s2316_s20  ;;  %p1461_p1 = scmp.ne.s32.totalorder %s302_s21, %s1460_s10 }
  0x6c   : > { %p2317_p13 = pneg %p1905_p6  ;;  %s1705_s17 = smov [#allocation5]  }
  0x6d   : > { %s1465_s1 = sshll.u32 %s1705_s17, 4  ;;  %s1466_s1 = int_to_ptr.vmem [resolvable:$false] %s1465_s1 }
  0x6e   : > { %s299_s27 = scalar_lea.hbm %s2314_s8, %s1899_s3  ;;  %p1463_p3 = pnand %p1461_p1, %p2317_p13 }
  0x6f   : > { %s341_s28 = scalar_lea.hbm %s2315_s0, %s1899_s3  ;;  %s1467_s12 = scalar_lea.vmem %s1466_s1, 512 }
  0x70   : > { %p1464_p7 = pneg %p1463_p3  ;;  %p1468_p12 = scmp.lt.s32.totalorder %s302_s21, %s1466_s1 }
  0x71   : > { %p1469_p2 = scmp.lt.s32.totalorder %s1467_s12, %s1460_s10 }
  0x73   : > { %p1470_p8 = por %p1469_p2, %p1468_p12 }
  0x75   : > { %p1471_p11 = pnand %p1470_p8, %p1464_p7 }
  0x77   : > { %1474 = shalt.err (!%p1471_p11)
}
  0x78   : > { %1191 = dma.hbm_to_vmem [thread:$0]  (!%p1905_p6), %s299_s27, 256, %s302_s21, %s288_s18  }
  0x79   : > { %s333_s23 = scalar_lea.vmem [#allocation10], %s1897_s11  ;;  %s373_s30 = sand.u32 1, %s1649_s26  }
  0x7a   : > { %s343_s8 = sshll.u32 %s333_s23, 4  ;;  %s1109_s6 = sshll.u32 %s373_s30, 8  ;;  %s344_s8 = int_to_ptr.vmem [resolvable:$true] %s343_s8 }
  0x7b   : > { %s1488_s25 = scalar_lea.vmem %s344_s8, 256  ;;  %p2318_p1 = pmov %p2317_p13 }
  0x7c   : > { %p1489_p5 = scmp.ne.s32.totalorder %s344_s8, %s1488_s25  ;;  %s1706_s20 = smov [#allocation10]  }
  0x7d   : > { %s1493_s10 = sshll.u32 %s1706_s20, 4  ;;  %s1494_s10 = int_to_ptr.vmem [resolvable:$false] %s1493_s10 }
  0x7e   : > { %p1491_p13 = pnand %p1489_p5, %p2318_p1  ;;  %s1495_s17 = scalar_lea.vmem %s1494_s10, 512 }
  0x7f   : > { %p1496_p7 = scmp.lt.s32.totalorder %s344_s8, %s1494_s10  ;;  %p1497_p12 = scmp.lt.s32.totalorder %s1495_s17, %s1488_s25 }
  0x80   : > { %p1492_p3 = pneg %p1491_p13 }
  0x81   : > { %p1498_p2 = por %p1497_p12, %p1496_p7 }
  0x83   : > { %p1499_p8 = pnand %p1498_p2, %p1492_p3 }
  0x85   : > { %1502 = shalt.err (!%p1499_p8)
}
  0x86   : > { %s2319_s11 = sld [smem:[#allocation32_spill]]  ;;  %s1113_s12 = sshll.u32 %s1697_s15, 8 }
  0x87   : > { %s2320_s18 = sld [smem:[#allocation33_spill]]  ;;  %s375_s30 = scalar_lea.vmem [#allocation13], %s1109_s6 }
  0x88   : > { %s387_s20 = sshll.u32 %s375_s30, 4  ;;  %s2322_s4 = sld [smem:[#allocation42_spill]]  ;;  %s388_s20 = int_to_ptr.vmem [resolvable:$true] %s387_s20 }
  0x89   : > { %p1505_p11 = pneg %p1938_p4  ;;  %s1516_s19 = scalar_lea.vmem %s388_s20, 4096 }
  0x8a   : > { %p1517_p5 = scmp.ne.s32.totalorder %s388_s20, %s1516_s19  ;;  %s1707_s3 = smov [#allocation13]  }
  0x8b   : > { %s1521_s27 = sshll.u32 %s1707_s3, 4  ;;  %s1522_s27 = int_to_ptr.vmem [resolvable:$false] %s1521_s27 }
  0x8c   : > { %1197 = dma.hbm_to_vmem [thread:$0]  (!%p1905_p6), %s341_s28, 256, %s344_s8, %s2319_s11  }
  0x8d   : > { %s384_s23 = sadd.s32 %s1113_s12, %s2320_s18  ;;  %p1519_p1 = pnand %p1517_p5, %p1505_p11 }
  0x8e   : > { %s1114_s25 = sshll.u32 %s384_s23, 6  ;;  %s1523_s28 = scalar_lea.vmem %s1522_s27, 8192 }
  0x8f   : > { %s386_s24 = scalar_lea.hbm %s2322_s4, %s1114_s25  ;;  %p1520_p13 = pneg %p1519_p1 }
  0x90   : > { %p1524_p6 = scmp.lt.s32.totalorder %s388_s20, %s1522_s27  ;;  %p1525_p3 = scmp.lt.s32.totalorder %s1523_s28, %s1516_s19 }
  0x92   : > { %p1526_p7 = por %p1525_p3, %p1524_p6 }
  0x94   : > { %p1527_p12 = pnand %p1526_p7, %p1520_p13 }
  0x96   : > { %1530 = shalt.err (!%p1527_p12)
}
  0x97   : > { %s1708_s8 = smov 256   ;;  %s1709_s6 = smov 128  }
  0x98   : > { %s1710_s4 = smov 8   ;;  %411 = sbr.rel (%p1944_p9) target bundleno = 868 (0x364), region = 48 }
  0x99   : > { %1203 = dma.hbm_to_vmem [thread:$0]  (!%p1938_p4), %s386_s24, 4096, %s388_s20, %s2002_s5, %s1708_s8, %s1709_s6, %s1710_s4  }
  0x9a   : > { %s2324_s21 = sld [smem:[#allocation22_spill]] (!%p1944_p9) }
  0xa0   : > { %s413_s12 = sand.u32 1, %s2324_s21  }
  0xa1   : > { %s2051_s23 = sshll.u32 %s413_s12, 4  ;;  %s414_s19 = scalar_lea.sflag [#allocation6], %s413_s12 }
  0xa2   : > { %s417_s30 = scalar_lea.vmem [#allocation5], %s2051_s23 }
  0xa3   : > { %1620 = dma.done.wait (%p1873_p10), %s414_s19, 256  }
  0xa4   : > { %1622 = vsyncadd (%p1873_p10), %s414_s19, 4294967040  ;;  %s2326_s25 = sld [smem:[#allocation26_spill]]  ;;  %s426_s20 = scalar_lea.vmem [#allocation8], %s2051_s23 }
  0xaa   : > { %s422_s5 = sand.u32 1, %s2326_s25  }
  0xab   : > { %s423_s1 = scalar_lea.sflag [#allocation9], %s422_s5 }
  0xac   : > { %1624 = dma.done.wait (%p1873_p10), %s423_s1, 512  }
  0xad   : > { %1626 = vsyncadd (%p1873_p10), %s423_s1, 4294966784  ;;  %s2327_s10 = sld [smem:[#allocation21_spill]]  ;;  %s435_s3 = scalar_lea.vmem [#allocation10], %s2051_s23 }
  0xae   : > { %s441_s27 = scalar_lea.sflag [#allocation12], %s422_s5 }
  0xb3   : > { %s442_s17 = sand.u32 1, %s2327_s10  }
  0xb4   : > { %s2065_s24 = sshll.u32 %s442_s17, 4 }
  0xb5   : > { %s444_s28 = scalar_lea.vmem [#allocation11], %s2065_s24 }
  0xb6   : > { %1628 = dma.done.wait (%p1972_p0), %s441_s27, 256  }
  0xb7   : > { %1630 = vsyncadd (%p1972_p0), %s441_s27, 4294967040  ;;  %s2328_s8 = sld [smem:[#allocation20_spill]] }
  0xb8   : > { %s2329_s6 = sld [smem:[#allocation30_spill]] }
  0xbd   : > { %s451_s4 = sand.u32 1, %s2328_s8  }
  0xbe   : > { %s1120_s11 = sshll.u32 %s451_s4, 8  ;;  %p2330_p10 = scmp.ne.s32.totalorder %s2329_s6, 0 }
  0xbf   : > { %s2074_s21 = scalar_lea.vmem [#allocation13], %s1120_s11 }
  0xc0   : > { %1632 = dma.done.wait (%p2330_p10), %s441_s27, 4096  }
  0xc1   : > { %1634 = vsyncadd (%p2330_p10), %s441_s27, 4294963200  ;;  %s2331_s18 = sld [smem:[#allocation24_spill]] }
  0xc2   : > { %s2332_s12 = sld [smem:[#allocation25_spill]] }
  0xc3   : > { %s2333_s19 = sld [smem:[#allocation23_spill]] }
  0xc4   : > { %s2334_s27 = sld [smem:[#allocation43_spill]] }
  0xc7   : > { %s1121_s22 = sshll.u32 %s2331_s18, 1  ;;  %p531_p2 = scmp.eq.s32.totalorder %s2331_s18, 0 }
  0xc8   : > { %p522_p0 = scmp.lt.s32.totalorder %s2332_s12, 1  ;;  %p524_p4 = scmp.lt.s32.totalorder %s1121_s22, 3 }
  0xc9   : > { %p530_p9 = scmp.eq.s32.totalorder %s2332_s12, 0  ;;  %p534_p8 = scmp.eq.s32.totalorder %s2333_s19, 0 }
  0xca   : > { %s523_s25 = scalar_select %p522_p0, %s2332_s12, 1 }
  0xcb   : > { %s2380_s22 = smov (!%p524_p4, %s1121_s22), 3  ;;  %p532_p11 = pnand %p531_p2, %p530_p9 }
  0xcc   : > { %s1122_s5 = sshll.u32 %s523_s25, 2 }
  0xcd   : > { %s2085_s1 = sadd.s32 %s1122_s5, %s2380_s22  ;;  %p533_p5 = pneg %p532_p11 }
  0xce   : > { %s528_s8 = scalar_lea.vmem %s2334_s27, %s2085_s1 }
  0xcf   : > { %p535_p1 = pnand %p534_p8, %p533_p5 }
  0xd1   : > { %538 = sbr.rel (%p535_p1) target bundleno = 218 (0xda), region = 72 }
  0xd6   : > { %vm539_vm0 = vcmask 0   ;;  %v1711_v0 = vmov 0.0  }
  0xd7   : > { %540 = vst.msk [vmem:[#allocation14] sm:$0x1] %vm539_vm0, %v1711_v0  ;;  %541 = vst [vmem:[#allocation2] sm:$0xff] %v1711_v0 }
  0xd8   : > { %542 = vst [vmem:[#allocation2 + $0x8] sm:$0xff] %v1711_v0  ;;  %543 = vst [vmem:[#allocation2 + $0x10] sm:$0xff] %v1711_v0 }
  0xd9   : > { %544 = vst [vmem:[#allocation2 + $0x18] sm:$0xff] %v1711_v0 }
  0xda PF: > { %s2335_s6 = sld [smem:[#allocation25_spill]] }
  0xe0   : > { %p545_p13 = scmp.gt.s32.totalorder %s2335_s6, 0 }
  0xe2   : > { %p546_p6 = pnand %p545_p13, %p531_p2 }
  0xe4   : > { %p547_p3 = pneg %p546_p6 }
  0xe6   : > { %p548_p7 = pnand %p547_p3, %p534_p8 }
  0xe8   : > { %551 = sbr.rel (%p548_p7) target bundleno = 240 (0xf0), region = 76 }
  0xed   : > { %v552_v1 = vld [vmem:[#allocation3] sm:$0xff]  ;;  %v553_v2 = vld [vmem:[#allocation3 + $0x8] sm:$0xff]  ;;  %v554_v3 = vld [vmem:[#allocation3 + $0x10] sm:$0xff] }
  0xee   : > { %556 = vst [vmem:[#allocation2] sm:$0xff] %v552_v1  ;;  %557 = vst [vmem:[#allocation2 + $0x8] sm:$0xff] %v553_v2  ;;  %v555_v4 = vld [vmem:[#allocation3 + $0x18] sm:$0xff] }
  0xef   : > { %558 = vst [vmem:[#allocation2 + $0x10] sm:$0xff] %v554_v3  ;;  %559 = vst [vmem:[#allocation2 + $0x18] sm:$0xff] %v555_v4 }
  0xf0 PF: > { %s2338_s18 = sld [smem:[#allocation23_spill]] }
  0xf6   : > { %p1123_p12 = scmp.ne.s32.totalorder %s2338_s18, 0 }
  0xf8   : > { %562 = sbr.rel (%p1123_p12) target bundleno = 255 (0xff), region = 80 }
  0xfd   : > { %v1712_v5 = vmov 0.0  }
  0xfe   : > { %563 = vst [vmem:[#allocation4] sm:$0xff] %v1712_v5  ;;  %564 = vst [vmem:[#allocation4 + $0x8] sm:$0xff] %v1712_v5 }
  0xff PF: > { %s2339_s22 = sld [smem:[#allocation40_spill]]  ;;  %v1713_v7 = vmov 0   ;;  %v1343_v9 = vld [vmem:[%s2074_s21 + $0x74] ss:$8 sps:$4 sm:$0xff]   ;;  %v1345_v10 = vld [vmem:[%s2074_s21 + $0x70] ss:$8 sps:$4 sm:$0xff]  }
 0x100   : > { %1342 = vset.pattern.permute.xlu0 %v1713_v7  ;;  %v1346_v11 = vld [vmem:[%s2074_s21 + $0x64] ss:$8 sps:$4 sm:$0xff]   ;;  %799 = vmatprep.subr.bf16.mxu0 %v1343_v9  ;;  %v1348_v12 = vld [vmem:[%s2074_s21 + $0x60] ss:$8 sps:$4 sm:$0xff]   ;;  %v1349_v13 = vld [vmem:[%s2074_s21 + $0x54] ss:$8 sps:$4 sm:$0xff]  }
 0x101   : > { %800 = vmatpush1.bf16.msra.mxu0 %v1345_v10  ;;  %v1351_v14 = vld [vmem:[%s2074_s21 + $0x50] ss:$8 sps:$4 sm:$0xff]   ;;  %v1352_v15 = vld [vmem:[%s2074_s21 + $0x44] ss:$8 sps:$4 sm:$0xff]   ;;  %v1354_v16 = vld [vmem:[%s2074_s21 + $0x40] ss:$8 sps:$4 sm:$0xff]  }
 0x102   : > { %801 = vmatprep.subr.bf16.mxu0 %v1346_v11  ;;  %v1355_v17 = vld [vmem:[%s2074_s21 + $0x34] ss:$8 sps:$4 sm:$0xff]   ;;  %v1357_v18 = vld [vmem:[%s2074_s21 + $0x30] ss:$8 sps:$4 sm:$0xff]   ;;  %v1358_v19 = vld [vmem:[%s2074_s21 + $0x24] ss:$8 sps:$4 sm:$0xff]  }
 0x103   : > { %v1360_v20 = vld [vmem:[%s2074_s21 + $0x20] ss:$8 sps:$4 sm:$0xff]   ;;  %v1361_v21 = vld [vmem:[%s2074_s21 + $0x14] ss:$8 sps:$4 sm:$0xff]   ;;  %v1363_v22 = vld [vmem:[%s2074_s21 + $0x10] ss:$8 sps:$4 sm:$0xff]  }
 0x104   : > { %v1364_v23 = vld [vmem:[%s2074_s21 + $0x4] ss:$8 sps:$4 sm:$0xff]   ;;  %v1366_v24 = vld [vmem:[%s2074_s21] ss:$8 sps:$4 sm:$0xff]   ;;  %v1367_v25 = vld [vmem:[%s2074_s21 + $0xf4] ss:$8 sps:$4 sm:$0xff]  }
 0x105   : > { %v565_v6 = vld [vmem:[%s2339_s22] sm:$0xff]  ;;  %802 = vmatpush1.bf16.msra.mxu0 %v1348_v12  ;;  %v1370_v27 = vld [vmem:[%s2074_s21 + $0xe4] ss:$8 sps:$4 sm:$0xff]   ;;  %v1372_v28 = vld [vmem:[%s2074_s21 + $0xe0] ss:$8 sps:$4 sm:$0xff]   ;;  %s2340_s25 = sld [smem:[#allocation23_spill]] }
 0x106   : > { %v570_v8 = vmul.f32 0.1, %v565_v6  ;;  %803 = vmatprep.subr.bf16.mxu0 %v1349_v13  ;;  %v1369_v26 = vld [vmem:[%s2074_s21 + $0xf0] ss:$8 sps:$4 sm:$0xff]   ;;  %v1373_v29 = vld [vmem:[%s2074_s21 + $0xd4] ss:$8 sps:$4 sm:$0xff]  }
 0x107   : > { %v1375_v30 = vld [vmem:[%s2074_s21 + $0xd0] ss:$8 sps:$4 sm:$0xff]   ;;  %v1376_v31 = vld [vmem:[%s2074_s21 + $0xc4] ss:$8 sps:$4 sm:$0xff]   ;;  %v1378_v32 = vld [vmem:[%s2074_s21 + $0xc0] ss:$8 sps:$4 sm:$0xff]  }
 0x108   : > { %573 = vperm.xlu0 %1342, %v570_v8   ;;  %v1379_v33 = vld [vmem:[%s2074_s21 + $0xb4] ss:$8 sps:$4 sm:$0xff]   ;;  %v1381_v34 = vld [vmem:[%s2074_s21 + $0xb0] ss:$8 sps:$4 sm:$0xff]   ;;  %v1382_v35 = vld [vmem:[%s2074_s21 + $0xa4] ss:$8 sps:$4 sm:$0xff]  }
 0x109   : > { %804 = vmatpush1.bf16.msra.mxu0 %v1351_v14  ;;  %v1384_v36 = vld [vmem:[%s2074_s21 + $0xa0] ss:$8 sps:$4 sm:$0xff]   ;;  %v1385_v37 = vld [vmem:[%s2074_s21 + $0x94] ss:$8 sps:$4 sm:$0xff]   ;;  %v1387_v38 = vld [vmem:[%s2074_s21 + $0x90] ss:$8 sps:$4 sm:$0xff]  }
 0x10a   : > { %805 = vmatprep.subr.bf16.mxu0 %v1352_v15  ;;  %v1388_v39 = vld [vmem:[%s2074_s21 + $0x84] ss:$8 sps:$4 sm:$0xff]   ;;  %v1390_v40 = vld [vmem:[%s2074_s21 + $0x80] ss:$8 sps:$4 sm:$0xff]   ;;  %s598_s27 = scalar_select %p530_p9, 1, 0 }
 0x10b   : > { %s1124_s10 = sshll.u32 %s2340_s25, 8  ;;  %v568_v41 = vld [vmem:[%s426_s20] sm:$0xff]  ;;  %v569_v42 = vld [vmem:[%s426_s20 + $0x8] sm:$0xff]  ;;  %p844_p10 = scmp.eq.s32.totalorder %s2340_s25, 1 }
 0x10c   : > { %582 = vperm.xlu0 %1342, %v565_v6   ;;  %s592_s17 = sshra.s32 %s1124_s10, 7  ;;  %v566_v44 = vld [vmem:[%s417_s30] sm:$0xff]  ;;  %v567_v45 = vld [vmem:[%s417_s30 + $0x8] sm:$0xff]  ;;  %v599_v50 = vstv %s598_s27  ;;  %p1158_p0 = scmp.ne.s32.totalorder %s2340_s25, 1 }
 0x10d   : > { %806 = vmatpush1.bf16.msra.mxu0 %v1354_v16  ;;  %s1125_s6 = sshll.u32 %s592_s17, 3  ;;  %v587_v51 = vld [vmem:[%s435_s3] sm:$0xff]  ;;  %v588_v52 = vld [vmem:[%s435_s3 + $0x8] sm:$0xff]  ;;  %vm600_vm1 = vcmp.eq.s32.totalorder %v599_v50, 1  ;;  %s2342_s23 = sld [smem:[#allocation24_spill]] (!%p1158_p0) }
 0x10e   : > { %807 = vmatprep.subr.bf16.mxu0 %v1355_v17  ;;  %s595_s20 = scalar_lea.vmem [#allocation2], %s1125_s6  ;;  %v603_v0 = vld [vmem:[#allocation4] sm:$0xff]  ;;  %v604_v2 = vld [vmem:[#allocation4 + $0x8] sm:$0xff] }
 0x10f   : > { %v596_v56 = vld [vmem:[%s595_s20] sm:$0xff]  ;;  %v597_v57 = vld [vmem:[%s595_s20 + $0x8] sm:$0xff] }
 0x111   : > { %808 = vmatpush1.bf16.msra.mxu0 %v1357_v18 }
 0x112   : > { %809 = vmatprep.subr.bf16.mxu0 %v1358_v19 }
 0x113   : > { %s1159_s30 = sshll.u32 (!%p1158_p0), %s2342_s23, 8 }
 0x114   : > { %s867_s11 = sshra.s32 (!%p1158_p0), %s1159_s30, 7 }
 0x115   : > { %810 = vmatpush1.bf16.msra.mxu0 %v1360_v20  ;;  %s1160_s18 = sshll.u32 (!%p1158_p0), %s867_s11, 3 }
 0x116   : > { %811 = vmatprep.subr.bf16.mxu0 %v1361_v21  ;;  %s870_s12 = scalar_lea.vmem (!%p1158_p0), [#allocation3], %s1160_s18 }
 0x119   : > { %812 = vmatpush1.bf16.msra.mxu0 %v1363_v22 }
 0x11a   : > { %813 = vmatprep.subr.bf16.mxu0 %v1364_v23 }
 0x11d   : > { %814 = vmatpush1.bf16.msra.mxu0 %v1366_v24 }
 0x11e   : > { %815 = vmatprep.subr.bf16.mxu0 %v1367_v25 }
 0x121   : > { %816 = vmatpush2.bf16.msra.mxu0 %v1369_v26 }
 0x122   : > { %817 = vmatprep.subr.bf16.mxu0 %v1370_v27 }
 0x125   : > { %818 = vmatpush2.bf16.msra.mxu0 %v1372_v28 }
 0x126   : > { %819 = vmatprep.subr.bf16.mxu0 %v1373_v29 }
 0x129   : > { %820 = vmatpush2.bf16.msra.mxu0 %v1375_v30 }
 0x12a   : > { %821 = vmatprep.subr.bf16.mxu0 %v1376_v31 }
 0x12d   : > { %822 = vmatpush2.bf16.msra.mxu0 %v1378_v32 }
 0x12e   : > { %823 = vmatprep.subr.bf16.mxu0 %v1379_v33 }
 0x131   : > { %824 = vmatpush2.bf16.msra.mxu0 %v1381_v34 }
 0x132   : > { %825 = vmatprep.subr.bf16.mxu0 %v1382_v35 }
 0x135   : > { %826 = vmatpush2.bf16.msra.mxu0 %v1384_v36 }
 0x136   : > { %827 = vmatprep.subr.bf16.mxu0 %v1385_v37 }
 0x139   : > { %828 = vmatpush2.bf16.msra.mxu0 %v1387_v38 }
 0x13a   : > { %829 = vmatprep.subr.bf16.mxu0 %v1388_v39 }
 0x13d   : > { %830 = vmatpush2.bf16.msra.mxu0 %v1390_v40 }
 0x183   : > { %v574_v43 = vpop.permute.xlu0 %573 }
 0x184   : > { %v576_v46 = vmul.f32 %v574_v43, %v568_v41  ;;  %v577_v47 = vmul.f32 %v574_v43, %v569_v42 }
 0x186   : > { %v578_v48 = vadd.f32 %v576_v46, %v566_v44  ;;  %v579_v49 = vadd.f32 %v577_v47, %v567_v45 }
 0x187   : > { %v583_v53 = vpop.permute.xlu0 %582 }
 0x188   : > { %v585_v54 = vadd.f32 %v583_v53, %v578_v48  ;;  %v586_v55 = vadd.f32 %v583_v53, %v579_v49 }
 0x18a   : > { %v589_v58 = vadd.f32 %v587_v51, %v585_v54  ;;  %v590_v59 = vadd.f32 %v588_v52, %v586_v55 }
 0x18c   : > { %v602_v60 = vsel %vm600_vm1, %v590_v59, %v597_v57  ;;  %v601_v61 = vsel %vm600_vm1, %v589_v58, %v596_v56 }
 0x18d   : > { %v606_v62 = vpack.c.bf16 %v602_v60, %v602_v60  ;;  %v605_v63 = vpack.c.bf16 %v601_v61, %v601_v61 }
 0x18f   : > { %831 = vmatprep.mubr.bf16.mxu0 %v606_v62 }
 0x190   : > { %832 = vmatmul.mubr.bf16.vlgmr.msra.gmra.mxu0 %v605_v63 }
 0x250   : > { %v833_v1 = vpop.f32.mrf.mxu0 }
 0x251   : > { %v840_v3 = vadd.f32 %v833_v1, %v603_v0 }
 0x252   : > { %v835_v4 = vpop.f32.mrf.mxu0  ;;  %847 = sbr.rel (%p1158_p0) target bundleno = 612 (0x264), region = 84 }
 0x253   : > { %842 = vst [vmem:[#allocation4] sm:$0xff] %v840_v3  ;;  %v841_v5 = vadd.f32 %v835_v4, %v604_v2 }
 0x254   : > { %v837_v6 = vpop.f32.mrf.mxu0 }
 0x255   : > { %843 = vst [vmem:[#allocation4 + $0x8] sm:$0xff] %v841_v5 }
 0x256   : > { %v838_v7 = vpop.f32.mrf.mxu0 }
 0x257   : > { %v852_v8 = vlaneseq  ;;  %v850_v10 = vld [vmem:[%s528_s8] sm:$0x3] }
 0x259   : > { %v853_v9 = vshrl.u32 %v852_v8, 7 }
 0x25a   : > { %v848_v13 = vld [vmem:[#allocation4] sm:$0xff] }
 0x25b   : > { %v854_v11 = vsub.s32 0, %v853_v9  ;;  %v858_v12 = vsub.s32 1, %v853_v9 }
 0x25c   : > { %v849_v14 = vld [vmem:[#allocation4 + $0x8] sm:$0xff] }
 0x25d   : > { %v855_v15 = vrot.slane %v850_v10, %v854_v11  ;;  %v859_v16 = vrot.slane %v850_v10, %v858_v12 }
 0x25f   : > { %v862_v17 = vadd.f32 %v855_v15, %v848_v13  ;;  %v863_v18 = vadd.f32 %v859_v16, %v849_v14 }
 0x261   : > { %v864_v19 = vmax.f32 %v862_v17, 0.0  ;;  %v865_v20 = vmax.f32 %v863_v18, 0.0 }
 0x263   : > { %871 = vst [vmem:[%s870_s12] sm:$0xff] %v864_v19  ;;  %872 = vst [vmem:[%s870_s12 + $0x8] sm:$0xff] %v865_v20 }
 0x264 PF: > { %s2344_s19 = sld [smem:[#allocation25_spill]] }
 0x26a   : > { %p873_p4 = scmp.eq.s32.totalorder %s2344_s19, 1 }
 0x26c   : > { %p874_p9 = pnand %p873_p4, %p844_p10 }
 0x26d   : > { %s2346_s1 = sld [smem:[#allocation24_spill]] (!%p874_p9) }
 0x26e   : > { %877 = sbr.rel (%p874_p9) target bundleno = 844 (0x34c), region = 88 }
 0x273   : > { %s1161_s8 = sshll.u32 %s2346_s1, 8  ;;  %v885_v21 = vld [vmem:[%s444_s28] sm:$0xff]  ;;  %v886_v22 = vld [vmem:[%s444_s28 + $0x8] sm:$0xff]  ;;  %vm905_vm2 = vcmask 0  }
 0x274   : > { %s879_s25 = sshra.s32 %s1161_s8, 7  ;;  %v889_v37 = vld [vmem:[#allocation14] sm:$0x1] }
 0x275   : > { %s1162_s5 = sshll.u32 %s879_s25, 3 }
 0x276   : > { %s882_s10 = scalar_lea.vmem [#allocation3], %s1162_s5 }
 0x277   : > { %v883_v23 = vld [vmem:[%s882_s10] sm:$0xff]  ;;  %v884_v24 = vld [vmem:[%s882_s10 + $0x8] sm:$0xff] }
 0x278   : > { %v887_v25 = vsub.f32 %v883_v23, %v885_v21  ;;  %v888_v26 = vsub.f32 %v884_v24, %v886_v22 }
 0x27a   : > { %v890_v27 = vmul.f32 %v887_v25, %v887_v25  ;;  %v891_v28 = vmul.f32 %v888_v26, %v888_v26 }
 0x27c   : > { %v892_v29 = vadd.f32 %v891_v28, %v890_v27 }
 0x27e   : > { %893 = vadd.xlane.f32.xlu0 %v892_v29 }
 0x307   : > { %v894_v30 = vpop.xlane.xlu0 %893 }
 0x308   : > { %v895_v31 = vrot.slane %v894_v30, 4 }
 0x30a   : > { %v896_v32 = vadd.f32 %v895_v31, %v894_v30 }
 0x30c   : > { %v897_v33 = vrot.slane %v896_v32, 2 }
 0x30e   : > { %v898_v34 = vadd.f32 %v897_v33, %v896_v32 }
 0x310   : > { %v899_v35 = vrot.slane %v898_v34, 1 }
 0x312   : > { %v900_v36 = vadd.f32 %v899_v35, %v898_v34 }
 0x314   : > { %1172 = vpush %v900_v36 }
 0x345   : > { %s1173_s17 = spop %1172 }
 0x346   : > { %s902_s24 = smul.f32 0.00024414063, %s1173_s17 }
 0x348   : > { %v903_v38 = vstv %s902_s24 }
 0x349   : > { %v904_v39 = vadd.f32 %v903_v38, %v889_v37 }
 0x34b   : > { %906 = vst.msk [vmem:[#allocation14] sm:$0x1] %vm905_vm2, %v904_v39 }
 0x34c PF: > { %s2347_s28 = sld [smem:[#allocation26_spill]]  ;;  %s1714_s27 = smov [#allocation14]  }
 0x34d   : > { %s914_s6 = sshll.u32 %s1714_s27, 4  ;;  %s915_s6 = int_to_ptr.vmem [resolvable:$true] %s914_s6 }
 0x34e   : > { %s1531_s20 = scalar_lea.vmem %s915_s6, 16  ;;  %s1537_s23 = scalar_lea.vmem %s915_s6, 32 }
 0x34f   : > { %p1532_p8 = scmp.ne.s32.totalorder %s915_s6, %s1531_s20  ;;  %p1538_p1 = scmp.lt.s32.totalorder %s915_s6, %s915_s6 }
 0x350   : > { %p1539_p13 = scmp.lt.s32.totalorder %s1537_s23, %s1531_s20 }
 0x352   : > { %p1205_p2 = scmp.eq.s32.totalorder %s2347_s28, 7  ;;  %p1540_p6 = por %p1539_p13, %p1538_p1 }
 0x354   : > { %p1533_p11 = pnand %p1532_p8, %p1205_p2 }
 0x356   : > { %p1534_p5 = pneg %p1533_p11 }
 0x358   : > { %p1541_p3 = pnand %p1540_p6, %p1534_p5 }
 0x35a   : > { %1544 = shalt.err (!%p1541_p3)
}
 0x35b   : > { %s2348_s21 = sld [smem:[#allocation44_spill]] }
 0x361   : > { %1185 = dma.vmem_to_hbm [thread:$0]  (%p1205_p2), %s915_s6, 16, %s2348_s21, [#allocation7]  }
 0x362   : > { %1636 = dma.done.wait (%p1205_p2), [#allocation7], 16  }
 0x363   : > { %1638 = vsyncadd (%p1205_p2), [#allocation7], 4294967280 }
 0x364 PF: > { %s27_s16 = sadd.s32 1, %s1701_s16   ;;  %s2350_s24 = sld [smem:[#allocation20_spill]] }
 0x365   : > { %p2183_p7 = scmp.ge.s32.totalorder %s27_s16, 10   ;;  %s2351_s27 = sld [smem:[#allocation21_spill]] }
 0x366   : > { %s2352_s30 = sld [smem:[#allocation22_spill]]  ;;  %s2357_s25 = smov %s1649_s26 }
 0x367   : > { %s2353_s11 = sld [smem:[#allocation31_spill]]  ;;  %s2358_s26 = smov %s1987_s2 }
 0x368   : > { %s2354_s18 = sld [smem:[#allocation27_spill]]  ;;  %s2359_s28 = smov %s1661_s29 }
 0x369   : > { %s2355_s19 = sld [smem:[#allocation36_spill]]  ;;  %s2360_s29 = smov %s1982_s7 }
 0x36a   : > { %s2356_s22 = sld [smem:[#allocation28_spill]]  ;;  %s2361_s8 = smov %s1673_s9 }
 0x36b   : > { %s2363_s10 = smov %s1689_s13  ;;  %s2365_s12 = smov %s1697_s15 }
 0x36c   :  { %26 = sbr.rel (!%p2183_p7) target bundleno = 23 (0x17), region = 159 }
 0x36d   : > { %s2362_s9 = smov %s2353_s11  ;;  %s2364_s11 = smov %s1693_s14 }
 0x36e   : > { %s2366_s13 = smov %s2354_s18 }
 0x36f   : > { %s2367_s14 = smov %s2355_s19 }
 0x370   : > { %s2368_s15 = smov %s2356_s22 }
 0x371   :  { %927 = vsyncpa [#allocation6], 1 }
 0x372   :  { %929 = vsyncpa [#allocation6 + $0x1], 1 }
 0x373   :  { %930 = vsyncpa [#allocation9], 1 }
 0x374   :  { %932 = vsyncpa [#allocation9 + $0x1], 1 }
 0x375   :  { %933 = vsyncpa [#allocation12], 1 }
 0x376   :  { %935 = vsyncpa [#allocation12 + $0x1], 1 }
 0x377   :  { %936 = vsyncpa [#allocation7], 1 }
 0x378   :  { %938 = vsyncpa [#allocation7 + $0x1], 1 }

</bundles_post_ra>
